<compile_context>
chip_gen: v7x
topology: tpu7x:2x2x1
jax: 0.10.0
libtpu: 0.0.40
codegen_flags: <defaults>
</compile_context>

<pallas_src>
import jax
import jax.numpy as jnp
import numpy as np
from jax import lax
from jax.experimental import pallas as pl
from jax.experimental.pallas import tpu as pltpu


def _make_vq_kernel(N, tile_n, steps_per_slice, num_blocks, K_pad, score_dtype):
    """Kernel closure over the static sizes (no SMEM scalar streams needed)."""

    def kernel(z_ref, stat_ref, e_ref, e_sq_ref, zq_ref, counts_ref, dw_ref, sse_ref):
        c = pl.program_id(0)          # parallel slice (megacore)
        s = pl.program_id(1)          # sequential token step within the slice

        # Accumulators live in the VMEM-resident output blocks (their block index
        # is constant along s) -> zero them on the first step of each slice.
        @pl.when(s == 0)
        def _():
            counts_ref[...] = jnp.zeros_like(counts_ref)
            dw_ref[...] = jnp.zeros_like(dw_ref)
            sse_ref[...] = jnp.zeros_like(sse_ref)

        blk_u = c * steps_per_slice + s                     # unclamped block id
        blk = jnp.minimum(blk_u, num_blocks - 1)            # block actually loaded (== index_map)
        iota = lax.broadcasted_iota(jnp.int32, (tile_n, 1), 0)
        real = (blk * tile_n + iota) < N       # rows whose z data is defined
        live = (blk_u * tile_n + iota) < N     # rows this step owns (all False on clamped excess steps)

        # Zero undefined rows with a select (NaN-safe) before anything hits the MXU.
        z = jnp.where(real, z_ref[...].astype(jnp.float32), 0.0)          # (TN, D)
        valid = jnp.where(live, stat_ref[...], 0.0)                        # (TN, 1) 1.0 = counts toward stats

        e = e_ref[...]                                                     # (K_pad, D) f32, resident
        # Nearest code: ||z||^2 is a per-row constant -> argmin needs only ||e||^2 - 2 z.e.
        cross = lax.dot_general(z.astype(score_dtype), e.astype(score_dtype),
                                (((1,), (1,)), ((), ())),
                                preferred_element_type=jnp.float32)        # (TN, K_pad)  MXU
        score = e_sq_ref[...] - 2.0 * cross                                # (TN, K_pad); pad codes hold 1e30
        k_iota = lax.broadcasted_iota(jnp.int32, score.shape, 1)
        min_val = jnp.min(score, axis=1, keepdims=True)
        idx = jnp.min(jnp.where(score <= min_val, k_iota, K_pad),
                      axis=1, keepdims=True)                               # first occurrence (torch.argmin)
        one_hot = (k_iota == idx).astype(jnp.float32)                      # (TN, K_pad)

        # Codebook gather (exact: one_hot is 0/1, e is f32).
        z_q = jnp.dot(one_hot, e, preferred_element_type=jnp.float32)      # (TN, D)  MXU
        zq_ref[...] = z_q.astype(zq_ref.dtype)

        # Masked statistics, accumulated into the resident output blocks.
        one_hot_valid = one_hot * valid                                    # (TN, K_pad)
        counts_ref[...] += jnp.sum(one_hot_valid, axis=0, keepdims=True)[None]   # (1, 1, K_pad)
        # dw^T = z^T @ one_hot_valid  (lane-dense in K_pad, no (TN,K) transpose).
        dw_t = lax.dot_general(z, one_hot_valid,
                               (((0,), (0,)), ((), ())),
                               preferred_element_type=jnp.float32)         # (D, K_pad)  MXU
        dw_ref[...] += dw_t[None]

        # Commitment-loss numerator over rows this step owns (track-padded rows
        # INCLUDED, exactly like F.mse_loss over the full z).
        diff = z_q - z
        sse_row = jnp.sum(diff * diff, axis=1, keepdims=True) * live.astype(jnp.float32)
        sse_ref[...] += jnp.sum(sse_row, axis=0, keepdims=True)[None]      # (1, 1, 1)

    return kernel


def vq_ema_forward(z, track_pad_mask, state, *, commitment_cost, decay,
                   epsilon=1e-5, training=True, tile_n=None, num_slices=2,
                   use_bf16_score=False):
    """Forward pass of VectorQuantizerEMA.

    z:              (..., D) float array (native dtype, NOT pre-cast)
    track_pad_mask: (...,)   bool array (True = padded token, excluded from stats)
    state: dict with 'embedding' (K, D), 'ema_w' (K, D),
           'ema_cluster_size' (K,), 'usage' (K,)
    Returns (quantized, loss, perplexity), new_state
    """
    embedding = state["embedding"].astype(jnp.float32)
    K, D = embedding.shape
    input_shape = z.shape
    assert input_shape[-1] == D
    in_dtype = z.dtype

    z_flat = z.reshape(-1, D)                      # native dtype, no cast/pad copies
    N = z_flat.shape[0]
    # 1.0 = token counts toward the EMA / usage / perplexity statistics
    stat_valid = jnp.logical_not(track_pad_mask.reshape(-1)).astype(jnp.float32)[:, None]

    # Codebook padded to a lane-dense multiple of 128 codes.  Pad codes get a huge
    # ||e||^2 so they never win the argmin (kept in the f32 score tensor on purpose:
    # do NOT move this sentinel into a bf16 tensor, it would saturate).
    K_pad = ((K + 127) // 128) * 128
    e_p = jnp.pad(embedding, ((0, K_pad - K), (0, 0)))            # (K_pad, D)
    e_sq = jnp.sum(e_p * e_p, axis=1)                             # hoisted ||e||^2
    e_sq = jnp.where(jnp.arange(K_pad) < K, e_sq, 1e30)[None, :]  # (1, K_pad)

    # ---- tile / grid selection -------------------------------------------------
    if tile_n is None:
        if D <= 64 and K_pad <= 512:
            tile_n = 1024
        elif K_pad <= 2048:
            tile_n = 512
        else:
            tile_n = 256
    tile_n = max(8, min(tile_n, ((N + 7) // 8) * 8))
    assert tile_n % 8 == 0
    G = pl.cdiv(N, tile_n)                        # token blocks
    NC = num_slices if G >= num_slices else 1     # parallel slices (2 -> both v7x TCs)
    SPC = pl.cdiv(G, NC)                          # sequential steps per slice

    # Explicit VMEM budget (v7x: 64 MiB physical / 32 MiB default scoped,
    # v5e: 16 MiB default scoped).
    in_bytes = jnp.dtype(in_dtype).itemsize
    vmem_est = ((K_pad * D + K_pad) * 4           # resident codebook + norms (single buffer)
                + 4 * tile_n * D * in_bytes       # z + zq tiles, double-buffered
                + 2 * tile_n * 4                  # stat-mask tiles
                + (D * K_pad + K_pad + 8) * 4     # resident accumulators
                + 6 * tile_n * K_pad * 4          # (TN, K_pad) temporaries
                + 4 * tile_n * D * 4)             # (TN, D) f32 temporaries
    vmem_limit = int(min(64 * 1024 * 1024, max(32 * 1024 * 1024, 2 * vmem_est)))

    score_dtype = jnp.bfloat16 if use_bf16_score else jnp.float32
    kernel = _make_vq_kernel(N, tile_n, SPC, G, K_pad, score_dtype)

    def tok_map(c, s):
        # Clamp so excess steps of the last slice (when NC*SPC > G) re-read the last
        # in-range block; their contribution is masked out in-kernel via `live`.
        return (jnp.minimum(c * SPC + s, G - 1), 0)

    zq, counts_nc, dwT_nc, sse_nc = pl.pallas_call(
        kernel,
        out_shape=(
            jax.ShapeDtypeStruct((N, D), in_dtype),             # z_q
            jax.ShapeDtypeStruct((NC, 1, K_pad), jnp.float32),  # per-slice counts
            jax.ShapeDtypeStruct((NC, D, K_pad), jnp.float32),  # per-slice dw^T
            jax.ShapeDtypeStruct((NC, 1, 1), jnp.float32),      # per-slice SSE
        ),
        grid_spec=pltpu.PrefetchScalarGridSpec(
            num_scalar_prefetch=0,
            grid=(NC, SPC),
            in_specs=[
                pl.BlockSpec((tile_n, D), tok_map),                  # z tile (native dtype)
                pl.BlockSpec((tile_n, 1), tok_map),                  # stats mask
                pl.BlockSpec((K_pad, D), lambda c, s: (0, 0),
                             pipeline_mode=pl.Buffered(1)),          # codebook: resident, single-buffered
                pl.BlockSpec((1, K_pad), lambda c, s: (0, 0),
                             pipeline_mode=pl.Buffered(1)),          # ||e||^2: resident, single-buffered
            ],
            out_specs=(
                pl.BlockSpec((tile_n, D), tok_map),
                pl.BlockSpec((1, 1, K_pad), lambda c, s: (c, 0, 0)),  # accumulators: block index constant
                pl.BlockSpec((1, D, K_pad), lambda c, s: (c, 0, 0)),  # along s -> VMEM-resident, one HBM
                pl.BlockSpec((1, 1, 1), lambda c, s: (c, 0, 0)),      # writeback per slice
            ),
        ),
        compiler_params=pltpu.CompilerParams(
            dimension_semantics=("parallel", "arbitrary"),
            vmem_limit_bytes=vmem_limit),
    )(z_flat, stat_valid, e_p, e_sq)

    # ---- tiny JAX epilogue over NC (<=2) partials --------------------------------
    counts = jnp.sum(counts_nc[:, 0, :], axis=0)[:K]              # (K,)  pad codes stripped
    dw = jnp.sum(dwT_nc, axis=0).T[:K]                            # (K, D)
    sse = jnp.sum(sse_nc)

    e_latent_loss = sse / (N * D)                                 # == F.mse_loss(z_q, z)
    loss = commitment_cost * e_latent_loss

    num_valid = jnp.sum(counts)
    # Guard the all-padded-batch edge case (the torch module would emit NaN here).
    avg_probs = counts / jnp.maximum(num_valid, 1.0)
    perplexity = jnp.exp(-jnp.sum(avg_probs * jnp.log(avg_probs + 1e-10)))

    # Straight-through estimator: forward value of `quantized` is z_q.
    # TODO(synk): the custom gradient (z + stop_grad(z_q - z)) is a JAX autodiff
    # concern (custom_vjp around this wrapper), not expressible in the forward kernel.
    quantized = zq.reshape(input_shape)

    # usage[min_enc] += 1 (advanced-index assignment: +1 per code that APPEARS among
    # non-pad tokens, duplicates do not accumulate), then usage /= 2.
    usage = (state["usage"] + (counts > 0).astype(jnp.float32)) / 2.0

    new_state = dict(state, usage=usage)
    if training:
        ema_cluster_size = state["ema_cluster_size"]
        ema_cluster_size = ema_cluster_size - (1.0 - decay) * (ema_cluster_size - counts)
        n = jnp.sum(ema_cluster_size)
        ema_cluster_size = (ema_cluster_size + epsilon) * n / (n + K * epsilon)
        ema_w = state["ema_w"] - (1.0 - decay) * (state["ema_w"] - dw)
        new_embedding = ema_w / ema_cluster_size[:, None]
        new_state.update(ema_cluster_size=ema_cluster_size, ema_w=ema_w,
                         embedding=new_embedding)

    return (quantized, loss, perplexity), new_state


def _reference_forward(z, mask, state, commitment_cost, decay, epsilon):
    """Pure-JAX reference of (quantized, loss, perplexity) and the EMA embedding."""
    emb = state["embedding"]
    K, D = emb.shape
    zf = z.reshape(-1, D).astype(jnp.float32)
    m = mask.reshape(-1)
    hi = jax.lax.Precision.HIGHEST
    dist = (jnp.sum(zf ** 2, 1, keepdims=True) + jnp.sum(emb ** 2, 1)
            - 2.0 * jnp.matmul(zf, emb.T, precision=hi))
    idx = jnp.argmin(dist, axis=1)
    one_hot = jax.nn.one_hot(idx, K, dtype=jnp.float32)
    z_q = emb[idx]                                    # == one_hot @ emb (exact gather)
    loss = commitment_cost * jnp.mean((z_q - zf) ** 2)
    keep = (~m).astype(jnp.float32)[:, None]
    counts = jnp.sum(one_hot * keep, axis=0)
    avg_probs = counts / jnp.sum(counts)
    perplexity = jnp.exp(-jnp.sum(avg_probs * jnp.log(avg_probs + 1e-10)))
    # EMA update (training path)
    cs = state["ema_cluster_size"] - (1.0 - decay) * (state["ema_cluster_size"] - counts)
    n = jnp.sum(cs)
    cs = (cs + epsilon) * n / (n + K * epsilon)
    dw = jnp.matmul((one_hot * keep).T, zf, precision=hi)
    ema_w = state["ema_w"] - (1.0 - decay) * (state["ema_w"] - dw)
    new_emb = ema_w / cs[:, None]
    return z_q.reshape(z.shape), loss, perplexity, new_emb


if __name__ == "__main__":
    # Module hyper-parameters (deterministic synthetic init -- no checkpoint).
    embedding_dim = 32
    num_embeddings = 64
    commitment_cost = 0.25
    decay = 0.99
    epsilon = 1e-5

    B, T = 2, 192     # -> N = 384 flattened tokens
    key = jax.random.PRNGKey(0)
    k_emb, k_idx, k_noise = jax.random.split(key, 3)

    # nn.Embedding weight ~ U(-1/K, 1/K)
    embedding = jax.random.uniform(
        k_emb, (num_embeddings, embedding_dim), jnp.float32,
        minval=-1.0 / num_embeddings, maxval=1.0 / num_embeddings)

    state = {
        "embedding": embedding,
        "ema_w": embedding,
        "ema_cluster_size": jnp.zeros((num_embeddings,), jnp.float32),
        "usage": jnp.ones((num_embeddings,), jnp.float32),
    }

    # Encoder-like inputs: each token sits close to one codebook entry so the
    # nearest-code decision is numerically unambiguous (kernel and pure-JAX
    # reference agree on argmin regardless of matmul rounding).
    code_ids = jax.random.randint(k_idx, (B, T), 0, num_embeddings)
    z = embedding[code_ids] + 1e-3 * jax.random.normal(
        k_noise, (B, T, embedding_dim), jnp.float32)
    # Mark the last 16 timesteps of each sequence as padding.
    track_pad_mask = jnp.zeros((B, T), jnp.bool_).at[:, -16:].set(True)

    q_ref, loss_ref, ppl_ref, emb_ref = _reference_forward(
        z, track_pad_mask, state, commitment_cost, decay, epsilon)

    # tile_n=64 exercises the 2-slice / multi-step accumulation path;
    # tile_n=None exercises the auto (single big tile) path.
    for tn in (64, None):
        (quantized, loss, perplexity), new_state = vq_ema_forward(
            z, track_pad_mask, state, commitment_cost=commitment_cost,
            decay=decay, epsilon=epsilon, training=True, tile_n=tn)
        jax.block_until_ready((quantized, loss, perplexity,
                               new_state["embedding"], new_state["usage"]))

        np.testing.assert_allclose(np.asarray(quantized), np.asarray(q_ref),
                                   rtol=1e-5, atol=1e-5)
        np.testing.assert_allclose(float(loss), float(loss_ref),
                                   rtol=1e-5, atol=1e-12)
        np.testing.assert_allclose(float(perplexity), float(ppl_ref),
                                   rtol=1e-5, atol=1e-4)
        np.testing.assert_allclose(np.asarray(new_state["embedding"]),
                                   np.asarray(emb_ref), rtol=1e-5, atol=1e-6)

    print("KERNEL_OK")
</pallas_src>

<mosaic_0001>
module attributes {stable_mosaic.version = 11 : i64} {
  func.func @kernel(%arg0: i32, %arg1: i32, %arg2: memref<64x32xf32, #tpu.memory_space<vmem>>, %arg3: memref<64x1xf32, #tpu.memory_space<vmem>>, %arg4: memref<128x32xf32, #tpu.memory_space<vmem>>, %arg5: memref<1x128xf32, #tpu.memory_space<vmem>>, %arg6: memref<64x32xf32, #tpu.memory_space<vmem>>, %arg7: memref<1x1x128xf32, #tpu.memory_space<vmem>>, %arg8: memref<1x32x128xf32, #tpu.memory_space<vmem>>, %arg9: memref<1x1x1xf32, #tpu.memory_space<vmem>>) attributes {dimension_semantics = [#tpu.dimension_semantics<parallel>, #tpu.dimension_semantics<arbitrary>], iteration_bounds = array<i64: 2, 3>, scalar_prefetch = 0 : i64, scratch_operands = 0 : i64, tpu.core_type = #tpu.core_type<tc>, window_params = [{transform_indices = @transform_0, window_bounds = array<i64: 64, 32>}, {transform_indices = @transform_1, window_bounds = array<i64: 64, 1>}, {pipeline_mode = #tpu.pipeline_mode<synchronous>, transform_indices = @transform_2, window_bounds = array<i64: 128, 32>}, {pipeline_mode = #tpu.pipeline_mode<synchronous>, transform_indices = @transform_3, window_bounds = array<i64: 1, 128>}, {transform_indices = @transform_4, window_bounds = array<i64: 64, 32>}, {transform_indices = @transform_5, window_bounds = array<i64: 1, 1, 128>}, {transform_indices = @transform_6, window_bounds = array<i64: 1, 32, 128>}, {transform_indices = @transform_7, window_bounds = array<i64: 1, 1, 1>}]} {
    %c0_i32 = arith.constant 0 : i32
    %0 = arith.cmpi eq, %arg1, %c0_i32 : i32
    %1 = arith.extui %0 : i1 to i32
    %c0_i32_0 = arith.constant 0 : i32
    %2 = arith.cmpi ne, %1, %c0_i32_0 : i32
    scf.if %2 {
      %cst_40 = arith.constant 0.000000e+00 : f32
      %73 = vector.broadcast %cst_40 : f32 to vector<1x1x128xf32>
      %c0_41 = arith.constant 0 : index
      %c0_42 = arith.constant 0 : index
      %c0_43 = arith.constant 0 : index
      %74 = vector.load %arg7[%c0_41, %c0_42, %c0_43] : memref<1x1x128xf32, #tpu.memory_space<vmem>>, vector<1x1x128xf32>
      tpu.vector_store %arg7[%c0_41, %c0_42, %c0_43], %73 {strides = array<i32>} : memref<1x1x128xf32, #tpu.memory_space<vmem>>, vector<1x1x128xf32>,
      %cst_44 = arith.constant 0.000000e+00 : f32
      %75 = vector.broadcast %cst_44 : f32 to vector<1x32x128xf32>
      %c0_45 = arith.constant 0 : index
      %c0_46 = arith.constant 0 : index
      %c0_47 = arith.constant 0 : index
      %76 = vector.load %arg8[%c0_45, %c0_46, %c0_47] : memref<1x32x128xf32, #tpu.memory_space<vmem>>, vector<1x32x128xf32>
      tpu.vector_store %arg8[%c0_45, %c0_46, %c0_47], %75 {strides = array<i32>} : memref<1x32x128xf32, #tpu.memory_space<vmem>>, vector<1x32x128xf32>,
      %cst_48 = arith.constant 0.000000e+00 : f32
      %77 = vector.broadcast %cst_48 : f32 to vector<1x1x1xf32>
      %c0_49 = arith.constant 0 : index
      %c0_50 = arith.constant 0 : index
      %c0_51 = arith.constant 0 : index
      %78 = vector.load %arg9[%c0_49, %c0_50, %c0_51] : memref<1x1x1xf32, #tpu.memory_space<vmem>>, vector<1x1x1xf32>
      tpu.vector_store %arg9[%c0_49, %c0_50, %c0_51], %77 {strides = array<i32>} : memref<1x1x1xf32, #tpu.memory_space<vmem>>, vector<1x1x1xf32>,
    } else {
    }
    %c3_i32 = arith.constant 3 : i32
    %3 = arith.muli %arg0, %c3_i32 : i32
    %4 = arith.addi %3, %arg1 : i32
    %c5_i32 = arith.constant 5 : i32
    %5 = arith.minsi %4, %c5_i32 : i32
    %6 = tpu.iota {dimensions = array<i32: 0>} : vector<64x1xi32>
    %c64_i32 = arith.constant 64 : i32
    %7 = arith.muli %5, %c64_i32 : i32
    %8 = vector.broadcast %7 : i32 to vector<64x1xi32>
    %9 = arith.addi %8, %6 : vector<64x1xi32>
    %c384_i32 = arith.constant 384 : i32
    %10 = vector.broadcast %c384_i32 : i32 to vector<64x1xi32>
    %11 = arith.cmpi slt, %9, %10 : vector<64x1xi32>
    %c64_i32_1 = arith.constant 64 : i32
    %12 = arith.muli %4, %c64_i32_1 : i32
    %13 = vector.broadcast %12 : i32 to vector<64x1xi32>
    %14 = arith.addi %13, %6 : vector<64x1xi32>
    %c384_i32_2 = arith.constant 384 : i32
    %15 = vector.broadcast %c384_i32_2 : i32 to vector<64x1xi32>
    %16 = arith.cmpi slt, %14, %15 : vector<64x1xi32>
    %c0 = arith.constant 0 : index
    %c0_3 = arith.constant 0 : index
    %17 = vector.load %arg2[%c0, %c0_3] : memref<64x32xf32, #tpu.memory_space<vmem>>, vector<64x32xf32>
    %cst = arith.constant 0.000000e+00 : f32
    %18 = vector.shape_cast %11 : vector<64x1xi1> to vector<64x1xi1>
    %19 = vector.broadcast %18 : vector<64x1xi1> to vector<64x32xi1>
    %20 = vector.broadcast %cst : f32 to vector<64x32xf32>
    %21 = arith.select %19, %17, %20 : vector<64x32xi1>, vector<64x32xf32>
    %c0_4 = arith.constant 0 : index
    %c0_5 = arith.constant 0 : index
    %22 = vector.load %arg3[%c0_4, %c0_5] : memref<64x1xf32, #tpu.memory_space<vmem>>, vector<64x1xf32>
    %cst_6 = arith.constant 0.000000e+00 : f32
    %23 = vector.broadcast %cst_6 : f32 to vector<64x1xf32>
    %24 = arith.select %16, %22, %23 : vector<64x1xi1>, vector<64x1xf32>
    %c0_7 = arith.constant 0 : index
    %c0_8 = arith.constant 0 : index
    %25 = vector.load %arg4[%c0_7, %c0_8] : memref<128x32xf32, #tpu.memory_space<vmem>>, vector<128x32xf32>
    %cst_9 = arith.constant dense<0.000000e+00> : vector<64x128xf32>
    %26 = tpu.matmul %21, %25, %cst_9 {dimension_numbers = #tpu.dot_dimension_numbers<[1], [1], [0], [0], [0, 0, 1, 0], [], []>} : vector<64x32xf32>, vector<128x32xf32>, vector<64x128xf32> -> vector<64x128xf32>
    %c0_10 = arith.constant 0 : index
    %c0_11 = arith.constant 0 : index
    %27 = vector.load %arg5[%c0_10, %c0_11] : memref<1x128xf32, #tpu.memory_space<vmem>>, vector<1x128xf32>
    %cst_12 = arith.constant 2.000000e+00 : f32
    %28 = vector.broadcast %cst_12 : f32 to vector<64x128xf32>
    %29 = arith.mulf %28, %26 : vector<64x128xf32>
    %30 = vector.broadcast %27 : vector<1x128xf32> to vector<64x128xf32>
    %31 = arith.subf %30, %29 : vector<64x128xf32>
    %32 = tpu.iota {dimensions = array<i32: 1>} : vector<64x128xi32>
    %cst_13 = arith.constant dense<0x7F800000> : vector<64xf32>
    %33 = vector.multi_reduction <minimumf>, %31, %cst_13 [1] : vector<64x128xf32> to vector<64xf32>
    %34 = vector.shape_cast %33 : vector<64xf32> to vector<64x1xf32>
    %35 = vector.broadcast %34 : vector<64x1xf32> to vector<64x128xf32>
    %36 = arith.cmpf ole, %31, %35 : vector<64x128xf32>
    %c128_i32 = arith.constant 128 : i32
    %37 = vector.broadcast %c128_i32 : i32 to vector<64x128xi32>
    %38 = arith.select %36, %32, %37 : vector<64x128xi1>, vector<64x128xi32>
    %cst_14 = arith.constant dense<2147483647> : vector<64xi32>
    %39 = vector.multi_reduction <minsi>, %38, %cst_14 [1] : vector<64x128xi32> to vector<64xi32>
    %40 = vector.shape_cast %39 : vector<64xi32> to vector<64x1xi32>
    %41 = vector.broadcast %40 : vector<64x1xi32> to vector<64x128xi32>
    %42 = arith.cmpi eq, %32, %41 : vector<64x128xi32>
    %43 = arith.extui %42 : vector<64x128xi1> to vector<64x128xi32>
    %44 = arith.sitofp %43 : vector<64x128xi32> to vector<64x128xf32>
    %cst_15 = arith.constant dense<0.000000e+00> : vector<64x32xf32>
    %45 = tpu.matmul %44, %25, %cst_15 {dimension_numbers = #tpu.dot_dimension_numbers<[1], [0], [0], [1], [0, 0, 1, 1], [], []>} : vector<64x128xf32>, vector<128x32xf32>, vector<64x32xf32> -> vector<64x32xf32>
    %c0_16 = arith.constant 0 : index
    %c0_17 = arith.constant 0 : index
    %46 = vector.load %arg6[%c0_16, %c0_17] : memref<64x32xf32, #tpu.memory_space<vmem>>, vector<64x32xf32>
    tpu.vector_store %arg6[%c0_16, %c0_17], %45 {strides = array<i32>} : memref<64x32xf32, #tpu.memory_space<vmem>>, vector<64x32xf32>,
    %47 = vector.broadcast %24 : vector<64x1xf32> to vector<64x128xf32>
    %48 = arith.mulf %44, %47 : vector<64x128xf32>
    %c0_18 = arith.constant 0 : index
    %c0_19 = arith.constant 0 : index
    %c0_20 = arith.constant 0 : index
    %49 = vector.load %arg7[%c0_18, %c0_19, %c0_20] : memref<1x1x128xf32, #tpu.memory_space<vmem>>, vector<1x1x128xf32>
    %cst_21 = arith.constant dense<0.000000e+00> : vector<128xf32>
    %50 = vector.multi_reduction <add>, %48, %cst_21 [0] : vector<64x128xf32> to vector<128xf32>
    %51 = vector.shape_cast %50 : vector<128xf32> to vector<1x128xf32>
    %52 = vector.shape_cast %51 : vector<1x128xf32> to vector<1x1x128xf32>
    %53 = arith.addf %49, %52 : vector<1x1x128xf32>
    %c0_22 = arith.constant 0 : index
    %c0_23 = arith.constant 0 : index
    %c0_24 = arith.constant 0 : index
    %54 = vector.load %arg7[%c0_22, %c0_23, %c0_24] : memref<1x1x128xf32, #tpu.memory_space<vmem>>, vector<1x1x128xf32>
    tpu.vector_store %arg7[%c0_22, %c0_23, %c0_24], %53 {strides = array<i32>} : memref<1x1x128xf32, #tpu.memory_space<vmem>>, vector<1x1x128xf32>,
    %cst_25 = arith.constant dense<0.000000e+00> : vector<32x128xf32>
    %55 = tpu.matmul %21, %48, %cst_25 {dimension_numbers = #tpu.dot_dimension_numbers<[0], [0], [1], [1], [0, 1, 1, 1], [], []>} : vector<64x32xf32>, vector<64x128xf32>, vector<32x128xf32> -> vector<32x128xf32>
    %c0_26 = arith.constant 0 : index
    %c0_27 = arith.constant 0 : index
    %c0_28 = arith.constant 0 : index
    %56 = vector.load %arg8[%c0_26, %c0_27, %c0_28] : memref<1x32x128xf32, #tpu.memory_space<vmem>>, vector<1x32x128xf32>
    %57 = vector.shape_cast %55 : vector<32x128xf32> to vector<1x32x128xf32>
    %58 = arith.addf %56, %57 : vector<1x32x128xf32>
    %c0_29 = arith.constant 0 : index
    %c0_30 = arith.constant 0 : index
    %c0_31 = arith.constant 0 : index
    %59 = vector.load %arg8[%c0_29, %c0_30, %c0_31] : memref<1x32x128xf32, #tpu.memory_space<vmem>>, vector<1x32x128xf32>
    tpu.vector_store %arg8[%c0_29, %c0_30, %c0_31], %58 {strides = array<i32>} : memref<1x32x128xf32, #tpu.memory_space<vmem>>, vector<1x32x128xf32>,
    %60 = arith.subf %45, %21 : vector<64x32xf32>
    %61 = arith.mulf %60, %60 : vector<64x32xf32>
    %cst_32 = arith.constant dense<0.000000e+00> : vector<64xf32>
    %62 = vector.multi_reduction <add>, %61, %cst_32 [1] : vector<64x32xf32> to vector<64xf32>
    %63 = vector.shape_cast %62 : vector<64xf32> to vector<64x1xf32>
    %64 = arith.extui %16 : vector<64x1xi1> to vector<64x1xi32>
    %65 = arith.sitofp %64 : vector<64x1xi32> to vector<64x1xf32>
    %66 = arith.mulf %63, %65 : vector<64x1xf32>
    %c0_33 = arith.constant 0 : index
    %c0_34 = arith.constant 0 : index
    %c0_35 = arith.constant 0 : index
    %67 = vector.load %arg9[%c0_33, %c0_34, %c0_35] : memref<1x1x1xf32, #tpu.memory_space<vmem>>, vector<1x1x1xf32>
    %cst_36 = arith.constant dense<0.000000e+00> : vector<1xf32>
    %68 = vector.multi_reduction <add>, %66, %cst_36 [0] : vector<64x1xf32> to vector<1xf32>
    %69 = vector.shape_cast %68 : vector<1xf32> to vector<1x1xf32>
    %70 = vector.shape_cast %69 : vector<1x1xf32> to vector<1x1x1xf32>
    %71 = arith.addf %67, %70 : vector<1x1x1xf32>
    %c0_37 = arith.constant 0 : index
    %c0_38 = arith.constant 0 : index
    %c0_39 = arith.constant 0 : index
    %72 = vector.load %arg9[%c0_37, %c0_38, %c0_39] : memref<1x1x1xf32, #tpu.memory_space<vmem>>, vector<1x1x1xf32>
    tpu.vector_store %arg9[%c0_37, %c0_38, %c0_39], %71 {strides = array<i32>} : memref<1x1x1xf32, #tpu.memory_space<vmem>>, vector<1x1x1xf32>,
    return
  }
  func.func @transform_0(%arg0: i32, %arg1: i32) -> (i32, i32) {
    %c3_i32 = arith.constant 3 : i32
    %0 = arith.muli %arg0, %c3_i32 : i32
    %1 = arith.addi %0, %arg1 : i32
    %c5_i32 = arith.constant 5 : i32
    %2 = arith.minsi %1, %c5_i32 : i32
    %c0_i32 = arith.constant 0 : i32
    %c0_i32_0 = arith.constant 0 : i32
    return %2, %c0_i32 : i32, i32
  }
  func.func @transform_1(%arg0: i32, %arg1: i32) -> (i32, i32) {
    %c3_i32 = arith.constant 3 : i32
    %0 = arith.muli %arg0, %c3_i32 : i32
    %1 = arith.addi %0, %arg1 : i32
    %c5_i32 = arith.constant 5 : i32
    %2 = arith.minsi %1, %c5_i32 : i32
    %c0_i32 = arith.constant 0 : i32
    %c0_i32_0 = arith.constant 0 : i32
    return %2, %c0_i32 : i32, i32
  }
  func.func @transform_2(%arg0: i32, %arg1: i32) -> (i32, i32) {
    %c0_i32 = arith.constant 0 : i32
    %c0_i32_0 = arith.constant 0 : i32
    %c0_i32_1 = arith.constant 0 : i32
    return %c0_i32, %c0_i32_0 : i32, i32
  }
  func.func @transform_3(%arg0: i32, %arg1: i32) -> (i32, i32) {
    %c0_i32 = arith.constant 0 : i32
    %c0_i32_0 = arith.constant 0 : i32
    %c0_i32_1 = arith.constant 0 : i32
    return %c0_i32, %c0_i32_0 : i32, i32
  }
  func.func @transform_4(%arg0: i32, %arg1: i32) -> (i32, i32) {
    %c3_i32 = arith.constant 3 : i32
    %0 = arith.muli %arg0, %c3_i32 : i32
    %1 = arith.addi %0, %arg1 : i32
    %c5_i32 = arith.constant 5 : i32
    %2 = arith.minsi %1, %c5_i32 : i32
    %c0_i32 = arith.constant 0 : i32
    %c0_i32_0 = arith.constant 0 : i32
    return %2, %c0_i32 : i32, i32
  }
  func.func @transform_5(%arg0: i32, %arg1: i32) -> (i32, i32, i32) {
    %c0_i32 = arith.constant 0 : i32
    %c0_i32_0 = arith.constant 0 : i32
    %c0_i32_1 = arith.constant 0 : i32
    return %arg0, %c0_i32, %c0_i32_0 : i32, i32, i32
  }
  func.func @transform_6(%arg0: i32, %arg1: i32) -> (i32, i32, i32) {
    %c0_i32 = arith.constant 0 : i32
    %c0_i32_0 = arith.constant 0 : i32
    %c0_i32_1 = arith.constant 0 : i32
    return %arg0, %c0_i32, %c0_i32_0 : i32, i32, i32
  }
  func.func @transform_7(%arg0: i32, %arg1: i32) -> (i32, i32, i32) {
    %c0_i32 = arith.constant 0 : i32
    %c0_i32_0 = arith.constant 0 : i32
    %c0_i32_1 = arith.constant 0 : i32
    return %arg0, %c0_i32, %c0_i32_0 : i32, i32, i32
  }
}

</mosaic_0001>

<bundles_post_ra>
// kernel: tpu_custom_call.1
= control target key start
LH: loop header
LB: loop body
LE: loop exit
PB: predicated region body
PF: predicated region fallthrough
CT: control target
= control target key end

     0   :  { %13 = vsyncpa [#allocation3], 0  ;;  %s2729_s0 = inlined_call_operand.vmem [shape: f32[384,32], index: 0, kind: input, shape index: {}]   ;;  %s2730_s1 = inlined_call_operand.vmem [shape: f32[384,1], index: 1, kind: input, shape index: {}]   ;;  %s2731_s2 = inlined_call_operand.vmem [shape: f32[128,32], index: 2, kind: input, shape index: {}]   ;;  %s2732_s3 = inlined_call_operand.vmem [shape: f32[1,128], index: 3, kind: input, shape index: {}]   ;;  %s2733_s4 = inlined_call_operand.vmem [shape: f32[384,32], index: 4, kind: output, shape index: {0}]   ;;  %s2734_s5 = inlined_call_operand.hbm [shape: f32[2,1,128], index: 5, kind: output, shape index: {1}]   ;;  %s2735_s6 = inlined_call_operand.hbm [shape: f32[2,32,128], index: 6, kind: output, shape index: {2}]   ;;  %s2736_s7 = inlined_call_operand.vmem [shape: f32[2,1,1], index: 7, kind: output, shape index: {3}]  }
   0x1   :  { %15 = vsyncpa [#allocation3 + $0x1], 0 }
   0x2   :  { %16 = vsyncpa [#allocation5], 0 }
   0x3   :  { %18 = vsyncpa [#allocation5 + $0x1], 0  ;;  %s2131_s24 = smov 0   ;;  %s2133_s25 = smov 0  }
   0x4   :  { %s2135_s26 = smov 0   ;;  %s2137_s27 = smov 0  }
   0x5   :  { %s2139_s28 = smov 0   ;;  %s2141_s29 = smov 0  }
   0x6   :  { %s2143_s30 = smov 0   ;;  %s2145_s8 = smov 0  }
   0x7 LB: > { %2745 = sst [smem:[#allocation8_spill]] %s2053_s24  ;;  %s1530_s9 = sadd.s32 4294967295, %s2081_s8   ;;  %s2081_s8 = sphi %s2145_s8, %s24_s8   ;;  %s2077_s30 = sphi %s2143_s30, %s2767_s30   ;;  %s2073_s29 = sphi %s2141_s29, %s2766_s29   ;;  %s2069_s28 = sphi %s2139_s28, %s2765_s28   ;;  %s2065_s27 = sphi %s2137_s27, %s2764_s27   ;;  %s2061_s26 = sphi %s2135_s26, %s2763_s26   ;;  %s2057_s25 = sphi %s2133_s25, %s2762_s25   ;;  %s2053_s24 = sphi %s2131_s24, %s2761_s24  }
   0x8   : > { %2746 = sst [smem:[#allocation9_spill]] %s2057_s25  ;;  %s1531_s10 = sadd.s32 4294967294, %s2081_s8  }
   0x9   : > { %2747 = sst [smem:[#allocation10_spill]] %s2061_s26  ;;  %s33_s11 = sadd.s32 1, %s2073_s29 }
   0xa   : > { %2748 = sst [smem:[#allocation11_spill]] %s2073_s29  ;;  %p34_p0 = scmp.ge.s32.totalorder %s33_s11, 3 }
   0xb   : > { %2749 = sst [smem:[#allocation12_spill]] %s2077_s30  ;;  %s36_s12 = sadd.s32 1, %s2077_s30 }
   0xc   : > { %p197_p1 = scmp.ne.s32.totalorder %s2061_s26, %s2057_s25  ;;  %p198_p2 = scmp.eq.s32.totalorder %s1530_s9, 5 }
   0xd   : > { %s2769_s11 = smov (%p34_p0, %s33_s11), 0  ;;  %s2771_s12 = smov (!%p34_p0, %s36_s12), %s2077_s30 }
   0xe   : > { %2750 = sst [smem:[#allocation13_spill]] %s2769_s11  ;;  %p2180_p3 = por %p198_p2, %p197_p1 }
   0xf   : > { %p203_p4 = scmp.ne.s32.totalorder %s2057_s25, %s2053_s24  ;;  %p38_p5 = scmp.ge.s32.totalorder %s2771_s12, 2 }
  0x10   : > { %p204_p6 = scmp.eq.s32.totalorder %s1531_s10, 5  ;;  %p1534_p7 = scmp.ge.s32.totalorder %s2081_s8, 1 }
  0x11   : > { %p314_p8 = scmp.lt.s32.totalorder %s2081_s8, 7  ;;  %s2773_s12 = smov (%p38_p5, %s2771_s12), 0 }
  0x12   : > { %2752 = sst [smem:[#allocation14_spill]] %s2773_s12  ;;  %p2190_p9 = por %p204_p6, %p203_p4 }
  0x13   : > { %p315_p10 = pnand %p1534_p7, %p314_p8  ;;  %s184_s15 = ssub.s32 %s2077_s30, %s2773_s12 }
  0x14   : > { %s2753_s14 = scalar_select %p2190_p9, 1, 0 }
  0x15   : > { %s187_s16 = sadd.s32 1, %s2061_s26  ;;  %p185_p11 = scmp.eq.s32.totalorder %s184_s15, 0 }
  0x16   : > { %2754 = sst [smem:[#allocation15_spill]] %s2753_s14  ;;  %318 = sbr.rel (%p315_p10) target bundleno = 1171 (0x493), region = 36 }
  0x17   : > { %s2198_s17 = scalar_select %p185_p11, %s2061_s26, %s187_s16  }
  0x18   : > { %s2201_s18 = sand.u32 (!%p315_p10), 1, %s2057_s25   ;;  %s375_s19 = smul.u32 (!%p315_p10), 3, %s2069_s28 }
  0x19   : > { %2755 = sst [smem:[#allocation16_spill]] %s2198_s17  ;;  %s1535_s20 = sshll.u32 (!%p315_p10), %s2201_s18, 5 }
  0x1a   : > { %s2206_s21 = sadd.s32 (!%p315_p10), %s2065_s27, %s375_s19  ;;  %p417_p13 = scmp.lt.s32.totalorder (!%p315_p10), %s2069_s28, 1 }
  0x1b   : > { %p377_p12 = scmp.lt.s32.totalorder (!%p315_p10), %s2206_s21, 5  ;;  %s2236_s10 = scalar_lea.vmem (!%p315_p10), [#allocation2], %s2201_s18 }
  0x1c   : > { %p1542_p1 = scmp.ne.s32.totalorder (!%p315_p10), %s2065_s27, 0 }
  0x1d   : > { %s2211_s22 = scalar_select %p377_p12, %s2206_s21, 5 }
  0x1e   : > { %s418_s23 = scalar_select %p417_p13, %s2069_s28, 1 }
  0x1f   : > { %s1536_s9 = sshll.u32 %s2211_s22, 3  ;;  %423 = sbr.rel (%p1542_p1) target bundleno = 38 (0x26), region = 40  ;;  %vm429_vm0 = vcmask (!%p1542_p1), 0   ;;  %v2083_v0 = vmov (!%p1542_p1), 0.0  }
  0x20   : > { %p380_p0 = scmp.lt.s32.totalorder %s1536_s9, 47  ;;  %s2218_s16 = scalar_lea.vmem %s2736_s7, %s418_s23  ;;  %424 = vst [vmem:[%s2236_s10] sm:$0x1] (!%p1542_p1), %v2083_v0 }
  0x21   : > { %s2238_s23 = scalar_lea.vmem [#allocation4], %s1535_s20  ;;  %430 = vst.msk [vmem:[%s2218_s16] sm:$0x1] (!%p1542_p1), %vm429_vm0, %v2083_v0 }
  0x22   : > { %s2775_s9 = smov (!%p380_p0, %s1536_s9), 47  ;;  %425 = vst [vmem:[%s2238_s23] sm:$0xff] (!%p1542_p1), %v2083_v0  ;;  %426 = vst [vmem:[%s2238_s23 + $0x8] sm:$0xff] (!%p1542_p1), %v2083_v0 }
  0x23   : > { %s1537_s12 = sshll.u32 %s2775_s9, 3  ;;  %427 = vst [vmem:[%s2238_s23 + $0x10] sm:$0xff] (!%p1542_p1), %v2083_v0  ;;  %428 = vst [vmem:[%s2238_s23 + $0x18] sm:$0xff] (!%p1542_p1), %v2083_v0 }
  0x24   : > { %s2223_s30 = scalar_lea.vmem %s2729_s0, %s1537_s12  ;;  %s2228_s26 = scalar_lea.vmem %s2730_s1, %s1537_s12 }
  0x25   : > { %s2233_s24 = scalar_lea.vmem %s2733_s4, %s1537_s12 }
  0x26 PF: > { %v528_v1 = vld [vmem:[%s2731_s2] sm:$0xff]  ;;  %v529_v2 = vld [vmem:[%s2731_s2 + $0x8] sm:$0xff]  ;;  %vm544_vm1 = vcmask 261120   ;;  %v530_v3 = vld [vmem:[%s2731_s2 + $0x10] sm:$0xff]  ;;  %v435_v4 = vlaneseq  ;;  %s1543_s17 = sshll.u32 %s2211_s22, 6  ;;  %s1325_s29 = scalar_lea.sflag [#allocation3], %s2201_s18 }
  0x27   : > { %v1775_v5 = vpack.c.bf16 %v529_v2, %v528_v1  ;;  %vm2259_vm2 = vmpackc.low %vm544_vm1, %vm544_vm1  ;;  %v531_v7 = vld [vmem:[%s2731_s2 + $0x18] sm:$0xff]  ;;  %v2266_v8 = vstv %s1543_s17  ;;  %v532_v11 = vld [vmem:[%s2731_s2 + $0x20] sm:$0xff]  ;;  %s2087_s11 = smov [#allocation2]  }
  0x28   : > { %v1781_v9 = vpack.c.bf16 %v531_v7, %v530_v3  ;;  %v2269_v10 = vshrl.u32 %v435_v4, 7  ;;  %v533_v12 = vld [vmem:[%s2731_s2 + $0x28] sm:$0xff]  ;;  %v480_v14 = vld [vmem:[%s2223_s30] sm:$0xff]  ;;  %v534_v17 = vld [vmem:[%s2731_s2 + $0x30] sm:$0xff]  ;;  %s1959_s12 = sshll.u32 %s2087_s11, 4  ;;  %s1960_s12 = int_to_ptr.vmem [resolvable:$false] %s1959_s12 }
  0x29   : > { %1777 = vmatprep.subr.msk.bf16.mxu0 %vm2259_vm2, %v1775_v5  ;;  %1824 = vmatprep.subr.bf16.mxu1 %v1775_v5  ;;  %v1787_v15 = vpack.c.bf16 %v533_v12, %v532_v11  ;;  %v535_v18 = vld [vmem:[%s2731_s2 + $0x38] sm:$0xff]  ;;  %v536_v20 = vld [vmem:[%s2731_s2 + $0x40] sm:$0xff]  ;;  %v537_v21 = vld [vmem:[%s2731_s2 + $0x48] sm:$0xff]  ;;  %s1961_s14 = scalar_lea.vmem %s1960_s12, 32 }
  0x2a   : > { %1780 = vmatpush3.bf16.xpose.msk.msra.mxu0 %vm2259_vm2, %v1775_v5  ;;  %v446_v13 = vadd.s32 %v2266_v8, %v2269_v10  ;;  %1826 = vmatpush3.bf16.msra.mxu1 %v1775_v5  ;;  %v1793_v19 = vpack.c.bf16 %v535_v18, %v534_v17  ;;  %v1799_v22 = vpack.c.bf16 %v537_v21, %v536_v20  ;;  %v538_v23 = vld [vmem:[%s2731_s2 + $0x50] sm:$0xff]  ;;  %v539_v24 = vld [vmem:[%s2731_s2 + $0x58] sm:$0xff]  ;;  %v540_v26 = vld [vmem:[%s2731_s2 + $0x60] sm:$0xff]  ;;  %v2345_v32 = vadd.s32 8, %v2269_v10 }
  0x2b   : > { %1783 = vmatprep.subr.msk.bf16.mxu0 %vm2259_vm2, %v1781_v9  ;;  %1828 = vmatprep.subr.bf16.mxu1 %v1781_v9  ;;  %v1805_v25 = vpack.c.bf16 %v539_v24, %v538_v23  ;;  %v541_v27 = vld [vmem:[%s2731_s2 + $0x68] sm:$0xff]  ;;  %v542_v29 = vld [vmem:[%s2731_s2 + $0x70] sm:$0xff]  ;;  %v543_v30 = vld [vmem:[%s2731_s2 + $0x78] sm:$0xff]  ;;  %v2348_v33 = vadd.s32 16, %v2269_v10  ;;  %v2353_v35 = vadd.s32 24, %v2269_v10  ;;  %v2358_v37 = vadd.s32 32, %v2269_v10 }
  0x2c   : > { %vm454_vm3 = vcmp.lt.s32.totalorder %v446_v13, 384  ;;  %v1811_v28 = vpack.c.bf16 %v541_v27, %v540_v26  ;;  %v1817_v31 = vpack.c.bf16 %v543_v30, %v542_v29  ;;  %v447_v34 = vadd.s32 %v2266_v8, %v2345_v32  ;;  %v481_v38 = vld [vmem:[%s2223_s30 + $0x8] sm:$0xff]  ;;  %v482_v41 = vld [vmem:[%s2223_s30 + $0x10] sm:$0xff]  ;;  %v483_v46 = vld [vmem:[%s2223_s30 + $0x18] sm:$0xff] }
  0x2d   : > { %v2286_v16 = vsel %vm454_vm3, %v480_v14, 0.0  ;;  %v448_v36 = vadd.s32 %v2266_v8, %v2348_v33  ;;  %v449_v39 = vadd.s32 %v2266_v8, %v2353_v35  ;;  %v2366_v40 = vadd.s32 40, %v2269_v10  ;;  %v484_v49 = vld [vmem:[%s2223_s30 + $0x20] sm:$0xff]  ;;  %v485_v53 = vld [vmem:[%s2223_s30 + $0x28] sm:$0xff]  ;;  %v486_v55 = vld [vmem:[%s2223_s30 + $0x30] sm:$0xff] }
  0x2e   : > { %1697 = vmatprep.mubr.msk.f32.mxu0 %vm544_vm1, %v2286_v16  ;;  %1830 = vmatpush3.bf16.msra.mxu1 %v1781_v9  ;;  %vm455_vm4 = vcmp.lt.s32.totalorder %v447_v34, 384  ;;  %v450_v42 = vadd.s32 %v2266_v8, %v2358_v37  ;;  %v2372_v43 = vadd.s32 48, %v2269_v10  ;;  %v2382_v48 = vadd.s32 56, %v2269_v10  ;;  %v487_v58 = vld [vmem:[%s2223_s30 + $0x38] sm:$0xff]  ;;  %v1569_v62 = vld [vmem:[%s2732_s3] ss:$0 sm:$0xff] }
  0x2f   : > { %1832 = vmatprep.subr.bf16.mxu1 %v1787_v15  ;;  %vm456_vm5 = vcmp.lt.s32.totalorder %v448_v36, 384  ;;  %v2374_v44 = vsel %vm455_vm4, %v481_v38, 0.0  ;;  %vm457_vm6 = vcmp.lt.s32.totalorder %v449_v39, 384  ;;  %v451_v47 = vadd.s32 %v2266_v8, %v2366_v40  ;;  %s1544_s30 = sshll.u32 %s2206_s21, 6 }
  0x30   : > { %v2376_v45 = vsel %vm456_vm5, %v482_v41, 0.0  ;;  %vm458_vm7 = vcmp.lt.s32.totalorder %v450_v42, 384  ;;  %v452_v50 = vadd.s32 %v2266_v8, %v2372_v43  ;;  %v2391_v51 = vsel %vm457_vm6, %v483_v46, 0.0 }
  0x31   : > { %v2393_v52 = vsel %vm458_vm7, %v484_v49, 0.0  ;;  %vm459_vm8 = vcmp.lt.s32.totalorder %v451_v47, 384  ;;  %v453_v54 = vadd.s32 %v2266_v8, %v2382_v48  ;;  %v2420_v24 = vand.u32 127, %v435_v4 }
  0x32   : > { %1786 = vmatpush3.bf16.xpose.msk.msra.mxu0 %vm2259_vm2, %v1781_v9  ;;  %1834 = vmatpush3.bf16.msra.mxu1 %v1787_v15  ;;  %vm460_vm9 = vcmp.lt.s32.totalorder %v452_v50, 384  ;;  %v2403_v56 = vsel %vm459_vm8, %v485_v53, 0.0 }
  0x33   : > { %1789 = vmatprep.subr.msk.bf16.mxu0 %vm2259_vm2, %v1787_v15  ;;  %1836 = vmatprep.subr.bf16.mxu1 %v1793_v19  ;;  %v2405_v57 = vsel %vm460_vm9, %v486_v55, 0.0  ;;  %vm461_vm10 = vcmp.lt.s32.totalorder %v453_v54, 384 }
  0x34   : > { %v2412_v59 = vsel %vm461_vm10, %v487_v58, 0.0 }
  0x36   : > { %1838 = vmatpush3.bf16.msra.mxu1 %v1793_v19 }
  0x37   : > { %1840 = vmatprep.subr.bf16.mxu1 %v1799_v22 }
  0x3a   : > { %1792 = vmatpush3.bf16.xpose.msk.msra.mxu0 %vm2259_vm2, %v1787_v15  ;;  %1842 = vmatpush3.bf16.msra.mxu1 %v1799_v22 }
  0x3b   : > { %1795 = vmatprep.subr.msk.bf16.mxu0 %vm2259_vm2, %v1793_v19  ;;  %1844 = vmatprep.subr.bf16.mxu1 %v1805_v25 }
  0x3e   : > { %1846 = vmatpush3.bf16.msra.mxu1 %v1805_v25 }
  0x3f   : > { %1848 = vmatprep.subr.bf16.mxu1 %v1811_v28 }
  0x42   : > { %1798 = vmatpush3.bf16.xpose.msk.msra.mxu0 %vm2259_vm2, %v1793_v19  ;;  %1850 = vmatpush3.bf16.msra.mxu1 %v1811_v28 }
  0x43   : > { %1801 = vmatprep.subr.msk.bf16.mxu0 %vm2259_vm2, %v1799_v22  ;;  %1852 = vmatprep.subr.bf16.mxu1 %v1817_v31 }
  0x46   : > { %1854 = vmatpush3.bf16.msra.mxu1 %v1817_v31 }
  0x4a   : > { %1804 = vmatpush3.bf16.xpose.msk.msra.mxu0 %vm2259_vm2, %v1799_v22 }
  0x4b   : > { %1807 = vmatprep.subr.msk.bf16.mxu0 %vm2259_vm2, %v1805_v25 }
  0x52   : > { %1810 = vmatpush3.bf16.xpose.msk.msra.mxu0 %vm2259_vm2, %v1805_v25 }
  0x53   : > { %1813 = vmatprep.subr.msk.bf16.mxu0 %vm2259_vm2, %v1811_v28 }
  0x5a   : > { %1816 = vmatpush3.bf16.xpose.msk.msra.mxu0 %vm2259_vm2, %v1811_v28 }
  0x5b   : > { %1819 = vmatprep.subr.msk.bf16.mxu0 %vm2259_vm2, %v1817_v31 }
  0x62   : > { %1822 = vmatpush3.bf16.xpose.msk.msra.mxu0 %vm2259_vm2, %v1817_v31 }
  0x69   : > { %1698 = vmatmul.mubr.msk.f32.vlgmr.msra.gmra.mrb[0].mxu0 %vm544_vm1, %v2374_v44 }
  0x6a   : > { %1700 = vmatprep.mubr.msk.f32.mxu0 %vm544_vm1, %v2376_v45 }
  0x6d   : > { %1701 = vmatmul.mubr.msk.f32.gmra.mrb[2].mxu0 %vm544_vm1, %v2391_v51 }
  0x6e   : > { %1703 = vmatprep.mubr.msk.f32.mxu0 %vm544_vm1, %v2393_v52 }
  0x71   : > { %1704 = vmatmul.mubr.msk.f32.gmra.mrb[4].mxu0 %vm544_vm1, %v2403_v56 }
  0x72   : > { %1706 = vmatprep.mubr.msk.f32.mxu0 %vm544_vm1, %v2405_v57 }
  0x75   : > { %1707 = vmatmul.mubr.msk.f32.gmra.mrb[6].mxu0 %vm544_vm1, %v2412_v59 }
 0x13c   : > { %v1699_v60 = vpop.f32.mrb[0].mxu0 }
 0x13d   : > { %v683_v61 = vpop.f32.mrb[1].mxu0  ;;  %v724_v0 = vmul.f32 2.0, %v1699_v60 }
 0x13e   : > { %v723_v63 = vmul.f32 2.0, %v683_v61 }
 0x13f   : > { %v738_v8 = vsub.f32 %v1569_v62, %v724_v0 }
 0x140   : > { %v1702_v1 = vpop.f32.mrb[2].mxu0  ;;  %v737_v2 = vsub.f32 %v1569_v62, %v723_v63 }
 0x141   : > { %v693_v3 = vpop.f32.mrb[3].mxu0  ;;  %v726_v5 = vmul.f32 2.0, %v1702_v1 }
 0x142   : > { %v725_v6 = vmul.f32 2.0, %v693_v3  ;;  %747 = vmin.xlane.f32.xlu0 %v737_v2 }
 0x143   : > { %v740_v14 = vsub.f32 %v1569_v62, %v726_v5 }
 0x144   : > { %v1705_v7 = vpop.f32.mrb[4].mxu0  ;;  %v739_v9 = vsub.f32 %v1569_v62, %v725_v6 }
 0x145   : > { %v703_v11 = vpop.f32.mrb[5].mxu0  ;;  %v728_v12 = vmul.f32 2.0, %v1705_v7  ;;  %v2084_v7 = vmov 0  }
 0x146   : > { %v727_v13 = vmul.f32 2.0, %v703_v11  ;;  %749 = vmin.xlane.f32.xlu0 %v738_v8  ;;  %751 = vmin.xlane.f32.xlu1 %v739_v9 }
 0x147   : > { %v742_v21 = vsub.f32 %v1569_v62, %v728_v12  ;;  %1954 = vset.pattern.permute.xlu1 %v2084_v7  ;;  %1953 = vset.pattern.permute.xlu0 %v2084_v7 }
 0x148   : > { %v1708_v15 = vpop.f32.mrb[6].mxu0  ;;  %v741_v17 = vsub.f32 %v1569_v62, %v727_v13 }
 0x149   : > { %v713_v18 = vpop.f32.mrb[7].mxu0  ;;  %v730_v19 = vmul.f32 2.0, %v1708_v15 }
 0x14a   : > { %v729_v20 = vmul.f32 2.0, %v713_v18  ;;  %753 = vmin.xlane.f32.xlu1 %v740_v14  ;;  %755 = vmin.xlane.f32.xlu0 %v741_v17 }
 0x14b   : > { %v744_v23 = vsub.f32 %v1569_v62, %v730_v19 }
 0x14c   : > { %v743_v22 = vsub.f32 %v1569_v62, %v729_v20 }
 0x14e   : > { %757 = vmin.xlane.f32.xlu1 %v742_v21  ;;  %759 = vmin.xlane.f32.xlu0 %v743_v22 }
 0x152   : > { %761 = vmin.xlane.f32.xlu1 %v744_v23 }
 0x1cf   : > { %v748_v25 = vpop.xlane.xlu0 %747 }
 0x1d0   : > { %vm763_vm11 = vcmp.le.f32.partialorder %v737_v2, %v748_v25 }
 0x1d1   : > { %v771_v26 = vsel %vm763_vm11, %v2420_v24, 128 }
 0x1d2   : > { %v780_v27 = vshra.s32 %v771_v26, 16 }
 0x1d3   : > { %v750_v28 = vpop.xlane.xlu0 %749  ;;  %v752_v29 = vpop.xlane.xlu1 %751 }
 0x1d4   : > { %vm764_vm12 = vcmp.le.f32.partialorder %v738_v8, %v750_v28  ;;  %vm765_vm13 = vcmp.le.f32.partialorder %v739_v9, %v752_v29  ;;  %v782_v30 = vcvt.s32.f32 %v780_v27  ;;  %v779_v8 = vand.u32 65535, %v771_v26 }
 0x1d5   : > { %v772_v31 = vsel %vm764_vm12, %v2420_v24, 128  ;;  %v773_v34 = vsel %vm765_vm13, %v2420_v24, 128 }
 0x1d6   : > { %783 = vmin.xlane.f32.xlu0 %v782_v30  ;;  %v794_v36 = vshra.s32 %v772_v31, 16  ;;  %v808_v38 = vshra.s32 %v773_v34, 16  ;;  %v793_v9 = vand.u32 65535, %v772_v31  ;;  %v807_v11 = vand.u32 65535, %v773_v34 }
 0x1d7   : > { %v754_v39 = vpop.xlane.xlu1 %753  ;;  %v756_v4 = vpop.xlane.xlu0 %755  ;;  %v781_v13 = vcvt.s32.f32 %v779_v8  ;;  %v518_v8 = vld [vmem:[%s2228_s26 + $0x30] sm:$0xff] }
 0x1d8   : > { %vm766_vm14 = vcmp.le.f32.partialorder %v740_v14, %v754_v39  ;;  %vm767_vm15 = vcmp.le.f32.partialorder %v741_v17, %v756_v4  ;;  %v796_v41 = vcvt.s32.f32 %v794_v36  ;;  %v810_v42 = vcvt.s32.f32 %v808_v38 }
 0x1d9   : > { %v774_v46 = vsel %vm766_vm14, %v2420_v24, 128  ;;  %v775_v47 = vsel %vm767_vm15, %v2420_v24, 128  ;;  %v795_v20 = vcvt.s32.f32 %v793_v9 }
 0x1da   : > { %797 = vmin.xlane.f32.xlu1 %v796_v41  ;;  %811 = vmin.xlane.f32.xlu0 %v810_v42  ;;  %v822_v49 = vshra.s32 %v774_v46, 16  ;;  %v836_v50 = vshra.s32 %v775_v47, 16  ;;  %v821_v15 = vand.u32 65535, %v774_v46  ;;  %v835_v17 = vand.u32 65535, %v775_v47 }
 0x1db   : > { %v758_v53 = vpop.xlane.xlu1 %757  ;;  %v760_v54 = vpop.xlane.xlu0 %759 }
 0x1dc   : > { %vm768_vm0 = vcmp.le.f32.partialorder %v742_v21, %v758_v53  ;;  %vm769_vm2 = vcmp.le.f32.partialorder %v743_v22, %v760_v54  ;;  %v824_v55 = vcvt.s32.f32 %v822_v49  ;;  %v838_v58 = vcvt.s32.f32 %v836_v50 }
 0x1dd   : > { %v776_v60 = vsel %vm768_vm0, %v2420_v24, 128  ;;  %v777_v61 = vsel %vm769_vm2, %v2420_v24, 128  ;;  %v809_v21 = vcvt.s32.f32 %v807_v11  ;;  %v823_v29 = vcvt.s32.f32 %v821_v15  ;;  %v519_v11 = vld [vmem:[%s2228_s26 + $0x38] sm:$0xff] }
 0x1de   : > { %825 = vmin.xlane.f32.xlu1 %v824_v55  ;;  %839 = vmin.xlane.f32.xlu0 %v838_v58  ;;  %v850_v62 = vshra.s32 %v776_v60, 16  ;;  %v864_v63 = vshra.s32 %v777_v61, 16  ;;  %v849_v25 = vand.u32 65535, %v776_v60  ;;  %v863_v26 = vand.u32 65535, %v777_v61  ;;  %v512_v61 = vld [vmem:[%s2228_s26] sm:$0xff] }
 0x1df   : > { %v762_v0 = vpop.xlane.xlu1 %761  ;;  %v463_v53 = vstv %s1544_s30 }
 0x1e0   : > { %vm770_vm3 = vcmp.le.f32.partialorder %v744_v23, %v762_v0  ;;  %v852_v1 = vcvt.s32.f32 %v850_v62  ;;  %v866_v2 = vcvt.s32.f32 %v864_v63  ;;  %v851_v4 = vcvt.s32.f32 %v849_v25  ;;  %v515_v0 = vld [vmem:[%s2228_s26 + $0x18] sm:$0xff] }
 0x1e1   : > { %v778_v3 = vsel %vm770_vm3, %v2420_v24, 128  ;;  %v2456_v54 = vadd.s32 %v463_v53, %v2345_v32  ;;  %v2464_v60 = vadd.s32 %v463_v53, %v2348_v33  ;;  %v2475_v63 = vadd.s32 %v463_v53, %v2353_v35  ;;  %v516_v35 = vld [vmem:[%s2228_s26 + $0x20] sm:$0xff] }
 0x1e2   : > { %853 = vmin.xlane.f32.xlu1 %v852_v1  ;;  %867 = vmin.xlane.f32.xlu0 %v866_v2  ;;  %v878_v5 = vshra.s32 %v778_v3, 16  ;;  %v877_v36 = vand.u32 65535, %v778_v3  ;;  %v2489_v3 = vadd.s32 %v463_v53, %v2366_v40  ;;  %v2503_v40 = vadd.s32 %v463_v53, %v2382_v48 }
 0x1e3   : > { %vm473_vm12 = vcmp.lt.s32.totalorder %v2456_v54, 384  ;;  %vm474_vm14 = vcmp.lt.s32.totalorder %v2464_v60, 384  ;;  %vm475_vm15 = vcmp.lt.s32.totalorder %v2475_v63, 384 }
 0x1e4   : > { %v880_v6 = vcvt.s32.f32 %v878_v5  ;;  %v879_v49 = vcvt.s32.f32 %v877_v36  ;;  %vm477_vm2 = vcmp.lt.s32.totalorder %v2489_v3, 384 }
 0x1e6   : > { %881 = vmin.xlane.f32.xlu1 %v880_v6 }
 0x263   : > { %v2430_v12 = vpop.xlane.xlu0 %783 }
 0x264   : > { %vm785_vm4 = vcmp.eq.f32.partialorder %v782_v30, %v2430_v12  ;;  %v837_v30 = vcvt.s32.f32 %v835_v17  ;;  %v790_v48 = vcvt.f32.s32 %v2430_v12  ;;  %v2085_v12 = vmov 1.0  }
 0x265   : > { %v786_v14 = vsel %vm785_vm4, %v781_v13, inf  ;;  %vm2744_vm4 = vcmp.lt.s32.totalorder %v2503_v40, 384 }
 0x266   : > { %787 = vmin.xlane.f32.xlu0 %v786_v14  ;;  %v791_v15 = vshll.u32 %v790_v48, 16 }
 0x267   : > { %v2433_v18 = vpop.xlane.xlu1 %797  ;;  %v2435_v19 = vpop.xlane.xlu0 %811 }
 0x268   : > { %vm799_vm5 = vcmp.eq.f32.partialorder %v796_v41, %v2433_v18  ;;  %vm813_vm6 = vcmp.eq.f32.partialorder %v810_v42, %v2435_v19  ;;  %v865_v41 = vcvt.s32.f32 %v863_v26  ;;  %v804_v13 = vcvt.f32.s32 %v2433_v18 }
 0x269   : > { %v800_v22 = vsel %vm799_vm5, %v795_v20, inf  ;;  %v814_v23 = vsel %vm813_vm6, %v809_v21, inf  ;;  %v818_v17 = vcvt.f32.s32 %v2435_v19 }
 0x26a   : > { %801 = vmin.xlane.f32.xlu1 %v800_v22  ;;  %815 = vmin.xlane.f32.xlu0 %v814_v23  ;;  %v805_v22 = vshll.u32 %v804_v13, 16 }
 0x26b   : > { %v2439_v27 = vpop.xlane.xlu1 %825  ;;  %v2441_v28 = vpop.xlane.xlu0 %839 }
 0x26c   : > { %vm827_vm7 = vcmp.eq.f32.partialorder %v824_v55, %v2439_v27  ;;  %vm841_vm8 = vcmp.eq.f32.partialorder %v838_v58, %v2441_v28  ;;  %v2459_v55 = vadd.s32 %v463_v53, %v2269_v10  ;;  %v513_v58 = vld [vmem:[%s2228_s26 + $0x8] sm:$0xff]  ;;  %v514_v10 = vld [vmem:[%s2228_s26 + $0x10] sm:$0xff]  ;;  %v832_v23 = vcvt.f32.s32 %v2439_v27 }
 0x26d   : > { %v828_v31 = vsel %vm827_vm7, %v823_v29, inf  ;;  %v842_v34 = vsel %vm841_vm8, %v837_v30, inf  ;;  %v521_v62 = vsel %vm473_vm12, %v513_v58, 0.0  ;;  %v522_v33 = vsel %vm474_vm14, %v514_v10, 0.0 }
 0x26e   : > { %829 = vmin.xlane.f32.xlu1 %v828_v31  ;;  %843 = vmin.xlane.f32.xlu0 %v842_v34  ;;  %vm472_vm13 = vcmp.lt.s32.totalorder %v2459_v55, 384  ;;  %v846_v25 = vcvt.f32.s32 %v2441_v28  ;;  %v819_v30 = vshll.u32 %v818_v17, 16  ;;  %v833_v36 = vshll.u32 %v832_v23, 16 }
 0x26f   : > { %v2445_v38 = vpop.xlane.xlu1 %853  ;;  %v2447_v39 = vpop.xlane.xlu0 %867  ;;  %v520_v32 = vsel %vm472_vm13, %v512_v61, 0.0 }
 0x270   : > { %vm855_vm9 = vcmp.eq.f32.partialorder %v852_v1, %v2445_v38  ;;  %vm869_vm10 = vcmp.eq.f32.partialorder %v866_v2, %v2447_v39  ;;  %v2482_v1 = vadd.s32 %v463_v53, %v2358_v37  ;;  %v523_v2 = vsel %vm475_vm15, %v515_v0, 0.0 }
 0x271   : > { %v856_v42 = vsel %vm855_vm9, %v851_v4, inf  ;;  %v870_v46 = vsel %vm869_vm10, %v865_v41, inf  ;;  %v2496_v37 = vadd.s32 %v463_v53, %v2372_v43  ;;  %v527_v43 = vsel %vm2744_vm4, %v519_v11, 0.0 }
 0x272   : > { %857 = vmin.xlane.f32.xlu1 %v856_v42  ;;  %871 = vmin.xlane.f32.xlu0 %v870_v46  ;;  %vm476_vm0 = vcmp.lt.s32.totalorder %v2482_v1, 384  ;;  %v847_v4 = vshll.u32 %v846_v25, 16  ;;  %v860_v41 = vcvt.f32.s32 %v2445_v38  ;;  %v874_v27 = vcvt.f32.s32 %v2447_v39 }
 0x273   : > { %v2451_v47 = vpop.xlane.xlu1 %881  ;;  %v524_v5 = vsel %vm476_vm0, %v516_v35, 0.0  ;;  %vm478_vm3 = vcmp.lt.s32.totalorder %v2496_v37, 384 }
 0x274   : > { %vm883_vm11 = vcmp.eq.f32.partialorder %v880_v6, %v2451_v47  ;;  %v517_v6 = vld [vmem:[%s2228_s26 + $0x28] sm:$0xff]  ;;  %v526_v9 = vsel %vm478_vm3, %v518_v8, 0.0  ;;  %v861_v58 = vshll.u32 %v860_v41, 16  ;;  %v875_v38 = vshll.u32 %v874_v27, 16  ;;  %s1353_s26 = sshll.u32 %s2236_s10, 4  ;;  %s1354_s26 = int_to_ptr.vmem [resolvable:$true] %s1353_s26 }
 0x275   : > { %v884_v50 = vsel %vm883_vm11, %v879_v49, inf  ;;  %v525_v7 = vsel %vm477_vm2, %v517_v6, 0.0  ;;  %v888_v39 = vcvt.f32.s32 %v2451_v47  ;;  %v2086_v6 = vmov 0.0   ;;  %s1955_s27 = scalar_lea.vmem %s1354_s26, 16  ;;  %p1962_p6 = scmp.lt.s32.totalorder %s1354_s26, %s1960_s12 }
 0x276   : > { %885 = vmin.xlane.f32.xlu1 %v884_v50  ;;  %p1956_p2 = scmp.ne.s32.totalorder %s1354_s26, %s1955_s27  ;;  %p1963_p7 = scmp.lt.s32.totalorder %s1961_s14, %s1955_s27 }
 0x278   : > { %p1957_p4 = pnand %p1956_p2, %p2180_p3  ;;  %p1964_p8 = por %p1963_p7, %p1962_p6 }
 0x27a   : > { %p1958_p5 = pneg %p1957_p4 }
 0x27c   : > { %p1965_p10 = pnand %p1964_p8, %p1958_p5 }
 0x287   : > { %1035 = vperm.xlu1 %1954, %v521_v62  }
 0x288   : > { %1030 = vperm.xlu0 %1953, %v520_v32  }
 0x28b   : > { %1040 = vperm.xlu1 %1954, %v522_v33  }
 0x28f   : > { %1045 = vperm.xlu1 %1954, %v523_v2   ;;  %v889_v2 = vshll.u32 %v888_v39, 16 }
 0x293   : > { %1050 = vperm.xlu1 %1954, %v524_v5  }
 0x297   : > { %1055 = vperm.xlu1 %1954, %v525_v7  }
 0x29b   : > { %1060 = vperm.xlu1 %1954, %v526_v9  }
 0x29f   : > { %1065 = vperm.xlu1 %1954, %v527_v43  }
 0x2c8   : > { %1092 = vxpose.xlu1.b32.start [1/8] (short) (narrow) %v2286_v16, 32 }
 0x2cc   : > { %1093 = vxpose.xlu1.b32.cont [2/8] (short) (narrow) %v2374_v44, 32 }
 0x2d0   : > { %1094 = vxpose.xlu1.b32.cont [3/8] (short) (narrow) %v2376_v45, 32 }
 0x2d4   : > { %1095 = vxpose.xlu1.b32.cont [4/8] (short) (narrow) %v2391_v51, 32 }
 0x2d8   : > { %1096 = vxpose.xlu1.b32.cont [5/8] (short) (narrow) %v2393_v52, 32 }
 0x2dc   : > { %1097 = vxpose.xlu1.b32.cont [6/8] (short) (narrow) %v2403_v56, 32 }
 0x2e0   : > { %1098 = vxpose.xlu1.b32.cont [7/8] (short) (narrow) %v2405_v57, 32 }
 0x2e4   : > { %1099 = vxpose.xlu1.b32.end [8/8] (short) (narrow) %v2412_v59, 32 }
 0x2f3   : > { %v788_v14 = vpop.xlane.xlu0 %787 }
 0x2f4   : > { %v789_v20 = vcvt.f32.s32 %v788_v14 }
 0x2f6   : > { %v792_v21 = vadd.s32 %v791_v15, %v789_v20 }
 0x2f7   : > { %v802_v26 = vpop.xlane.xlu1 %801  ;;  %v816_v29 = vpop.xlane.xlu0 %815 }
 0x2f8   : > { %v803_v31 = vcvt.f32.s32 %v802_v26  ;;  %v817_v34 = vcvt.f32.s32 %v816_v29  ;;  %vm891_vm5 = vcmp.eq.s32.totalorder %v2420_v24, %v792_v21 }
 0x2f9   : > { %1741 = vmatprep.mubr.msk.f32.mxu1 %vm891_vm5, %v2085_v12  ;;  %v1570_v9 = vsel %vm891_vm5, 1.0, %v2086_v6 }
 0x2fa   : > { %v806_v18 = vadd.s32 %v805_v22, %v803_v31  ;;  %v820_v19 = vadd.s32 %v819_v30, %v817_v34 }
 0x2fb   : > { %v830_v28 = vpop.xlane.xlu1 %829  ;;  %v844_v42 = vpop.xlane.xlu0 %843 }
 0x2fc   : > { %v831_v46 = vcvt.f32.s32 %v830_v28  ;;  %v845_v49 = vcvt.f32.s32 %v844_v42  ;;  %vm892_vm6 = vcmp.eq.s32.totalorder %v2420_v24, %v806_v18  ;;  %vm893_vm7 = vcmp.eq.s32.totalorder %v2420_v24, %v820_v19 }
 0x2fd   : > { %1742 = vmatmul.mubr.msk.f32.vlgmr.msra.gmra.mrb[0].mxu1 %vm892_vm6, %v2085_v12  ;;  %v1571_v7 = vsel %vm892_vm6, 1.0, %v2086_v6  ;;  %v1572_v17 = vsel %vm893_vm7, 1.0, %v2086_v6 }
 0x2fe   : > { %v834_v50 = vadd.s32 %v833_v36, %v831_v46  ;;  %v848_v53 = vadd.s32 %v847_v4, %v845_v49  ;;  %1744 = vmatprep.mubr.msk.f32.mxu1 %vm893_vm7, %v2085_v12 }
 0x2ff   : > { %v858_v61 = vpop.xlane.xlu1 %857  ;;  %v872_v62 = vpop.xlane.xlu0 %871 }
 0x300   : > { %v859_v32 = vcvt.f32.s32 %v858_v61  ;;  %v873_v10 = vcvt.f32.s32 %v872_v62  ;;  %vm894_vm8 = vcmp.eq.s32.totalorder %v2420_v24, %v834_v50  ;;  %vm895_vm9 = vcmp.eq.s32.totalorder %v2420_v24, %v848_v53 }
 0x301   : > { %1745 = vmatmul.mubr.msk.f32.gmra.mrb[2].mxu1 %vm894_vm8, %v2085_v12  ;;  %v1573_v22 = vsel %vm894_vm8, 1.0, %v2086_v6  ;;  %v1574_v31 = vsel %vm895_vm9, 1.0, %v2086_v6 }
 0x302   : > { %v862_v33 = vadd.s32 %v861_v58, %v859_v32  ;;  %v876_v0 = vadd.s32 %v875_v38, %v873_v10  ;;  %1747 = vmatprep.mubr.msk.f32.mxu1 %vm895_vm9, %v2085_v12 }
 0x303   : > { %v886_v35 = vpop.xlane.xlu1 %885 }
 0x304   : > { %v887_v5 = vcvt.f32.s32 %v886_v35  ;;  %vm896_vm10 = vcmp.eq.s32.totalorder %v2420_v24, %v862_v33  ;;  %vm897_vm11 = vcmp.eq.s32.totalorder %v2420_v24, %v876_v0  ;;  %v1076_v33 = vld [vmem:[%s2236_s10] sm:$0x1] }
 0x305   : > { %1748 = vmatmul.mubr.msk.f32.gmra.mrb[4].mxu1 %vm896_vm10, %v2085_v12  ;;  %v1575_v18 = vsel %vm896_vm10, 1.0, %v2086_v6  ;;  %v1576_v28 = vsel %vm897_vm11, 1.0, %v2086_v6 }
 0x306   : > { %v890_v47 = vadd.s32 %v889_v2, %v887_v5  ;;  %1750 = vmatprep.mubr.msk.f32.mxu1 %vm897_vm11, %v2085_v12 }
 0x307   : > { %v1036_v8 = vpop.permute.xlu1 %1035  ;;  %v1031_v11 = vpop.permute.xlu0 %1030 }
 0x308   : > { %v1069_v43 = vmul.f32 %v1571_v7, %v1036_v8  ;;  %v1068_v48 = vmul.f32 %v1570_v9, %v1031_v11  ;;  %vm898_vm4 = vcmp.eq.s32.totalorder %v2420_v24, %v890_v47 }
 0x309   : > { %1751 = vmatmul.mubr.msk.f32.gmra.mrb[6].mxu1 %vm898_vm4, %v2085_v12  ;;  %v1577_v46 = vsel %vm898_vm4, 1.0, %v2086_v6  ;;  %vm1124_vm4 = vcmask 523264  }
 0x30a   : > { %v1077_v13 = vadd.f32 %v1069_v43, %v1068_v48  ;;  %v1855_v14 = vpack.c.bf16 %v1069_v43, %v1068_v48 }
 0x30b   : > { %v1041_v15 = vpop.permute.xlu1 %1040 }
 0x30c   : > { %v1070_v20 = vmul.f32 %v1572_v17, %v1041_v15  ;;  %1856 = vmatprep.subr.bf16.mxu1 %v1855_v14 }
 0x30d   : > { %1858 = vmatpush3.bf16.msra.mxu1 %v1855_v14 }
 0x30e   : > { %v1078_v21 = vadd.f32 %v1077_v13, %v1070_v20 }
 0x30f   : > { %v1046_v23 = vpop.permute.xlu1 %1045 }
 0x310   : > { %v1071_v25 = vmul.f32 %v1573_v22, %v1046_v23 }
 0x312   : > { %v1079_v26 = vadd.f32 %v1078_v21, %v1071_v25  ;;  %v1859_v29 = vpack.c.bf16 %v1071_v25, %v1070_v20 }
 0x313   : > { %v1051_v30 = vpop.permute.xlu1 %1050 }
 0x314   : > { %v1072_v34 = vmul.f32 %v1574_v31, %v1051_v30  ;;  %1860 = vmatprep.subr.bf16.mxu1 %v1859_v29 }
 0x315   : > { %1862 = vmatpush3.bf16.msra.mxu1 %v1859_v29 }
 0x316   : > { %v1080_v12 = vadd.f32 %v1079_v26, %v1072_v34 }
 0x317   : > { %v1056_v19 = vpop.permute.xlu1 %1055 }
 0x318   : > { %v1073_v36 = vmul.f32 %v1575_v18, %v1056_v19 }
 0x31a   : > { %v1081_v4 = vadd.f32 %v1080_v12, %v1073_v36  ;;  %v1863_v41 = vpack.c.bf16 %v1073_v36, %v1072_v34 }
 0x31b   : > { %v1061_v27 = vpop.permute.xlu1 %1060 }
 0x31c   : > { %v1074_v42 = vmul.f32 %v1576_v28, %v1061_v27  ;;  %1864 = vmatprep.subr.bf16.mxu1 %v1863_v41 }
 0x31d   : > { %1866 = vmatpush3.bf16.msra.mxu1 %v1863_v41 }
 0x31e   : > { %v1082_v50 = vadd.f32 %v1081_v4, %v1074_v42 }
 0x31f   : > { %v1066_v49 = vpop.permute.xlu1 %1065 }
 0x320   : > { %v1075_v53 = vmul.f32 %v1577_v46, %v1066_v49 }
 0x322   : > { %v1083_v58 = vadd.f32 %v1082_v50, %v1075_v53  ;;  %v1867_v38 = vpack.c.bf16 %v1075_v53, %v1074_v42 }
 0x324   : > { %v1084_v39 = vrot.slane %v1083_v58, 4  ;;  %1868 = vmatprep.subr.bf16.mxu1 %v1867_v38 }
 0x325   : > { %1870 = vmatpush3.bf16.msra.mxu1 %v1867_v38 }
 0x326   : > { %v1085_v61 = vadd.f32 %v1084_v39, %v1083_v58 }
 0x328   : > { %v1086_v62 = vrot.slane %v1085_v61, 2 }
 0x32a   : > { %v1087_v32 = vadd.f32 %v1086_v62, %v1085_v61 }
 0x32c   : > { %v1088_v10 = vrot.slane %v1087_v32, 1 }
 0x32e   : > { %v1089_v0 = vadd.f32 %v1088_v10, %v1087_v32 }
 0x330   : > { %v1090_v2 = vadd.f32 %v1089_v0, %v1076_v33 }
 0x332   : > { %1091 = vst [vmem:[%s2236_s10] sm:$0x1] %v1090_v2 }
 0x348   : > { %v1108_v24 = vpop.trf.xlu1 }
 0x349   : > { %1769 = vmatprep.mubr.msk.f32.mxu1 %vm1124_vm4, %v1108_v24 }
 0x34c   : > { %v1109_v35 = vpop.trf.xlu1 }
 0x34d   : > { %1770 = vmatmul.mubr.msk.f32.vlgmr.msra.gmra.mrb[8].mxu1 %vm1124_vm4, %v1109_v35 }
 0x350   : > { %v1110_v5 = vpop.trf.xlu1 }
 0x351   : > { %1772 = vmatprep.mubr.msk.f32.mxu1 %vm1124_vm4, %v1110_v5 }
 0x354   : > { %v1111_v47 = vpop.trf.xlu1 }
 0x355   : > { %1773 = vmatmul.mubr.msk.f32.gmra.mrb[10].mxu1 %vm1124_vm4, %v1111_v47 }
 0x3d0   : > { %v1743_v7 = vpop.f32.mrb[0].mxu1 }
 0x3d1   : > { %1021 = vst.msk [vmem:[%s2233_s24 + $0x8] sm:$0xff] %vm544_vm1, %v1743_v7  ;;  %v1235_v8 = vsub.f32 %v1743_v7, %v2374_v44  ;;  %v981_v9 = vpop.f32.mrb[1].mxu1 }
 0x3d2   : > { %1020 = vst.msk [vmem:[%s2233_s24] sm:$0xff] %vm544_vm1, %v981_v9  ;;  %v1234_v11 = vsub.f32 %v981_v9, %v2286_v16 }
 0x3d3   : > { %v1243_v43 = vmul.f32 %v1235_v8, %v1235_v8 }
 0x3d4   : > { %v1746_v48 = vpop.f32.mrb[2].mxu1  ;;  %v1242_v13 = vmul.f32 %v1234_v11, %v1234_v11 }
 0x3d5   : > { %1023 = vst.msk [vmem:[%s2233_s24 + $0x18] sm:$0xff] %vm544_vm1, %v1746_v48  ;;  %v1237_v14 = vsub.f32 %v1746_v48, %v2391_v51  ;;  %v991_v15 = vpop.f32.mrb[3].mxu1  ;;  %v1253_v17 = vsel %vm544_vm1, %v1243_v43, 0.0 }
 0x3d6   : > { %1022 = vst.msk [vmem:[%s2233_s24 + $0x10] sm:$0xff] %vm544_vm1, %v991_v15  ;;  %1254 = vadd.xlane.f32.xlu0 %v1253_v17  ;;  %v1236_v16 = vsub.f32 %v991_v15, %v2376_v45  ;;  %v1250_v22 = vsel %vm544_vm1, %v1242_v13, 0.0 }
 0x3d7   : > { %v1245_v20 = vmul.f32 %v1237_v14, %v1237_v14 }
 0x3d8   : > { %v1749_v44 = vpop.f32.mrb[4].mxu1  ;;  %v1244_v23 = vmul.f32 %v1236_v16, %v1236_v16 }
 0x3d9   : > { %1025 = vst.msk [vmem:[%s2233_s24 + $0x28] sm:$0xff] %vm544_vm1, %v1749_v44  ;;  %v1001_v21 = vpop.f32.mrb[5].mxu1  ;;  %v1239_v25 = vsub.f32 %v1749_v44, %v2403_v56  ;;  %v1259_v29 = vsel %vm544_vm1, %v1245_v20, 0.0 }
 0x3da   : > { %1024 = vst.msk [vmem:[%s2233_s24 + $0x20] sm:$0xff] %vm544_vm1, %v1001_v21  ;;  %1251 = vadd.xlane.f32.xlu0 %v1250_v22  ;;  %v1238_v30 = vsub.f32 %v1001_v21, %v2393_v52  ;;  %v1256_v31 = vsel %vm544_vm1, %v1244_v23, 0.0 }
 0x3db   : > { %v1247_v45 = vmul.f32 %v1239_v25, %v1239_v25 }
 0x3dc   : > { %v1752_v51 = vpop.f32.mrb[6].mxu1  ;;  %v1246_v34 = vmul.f32 %v1238_v30, %v1238_v30 }
 0x3dd   : > { %1027 = vst.msk [vmem:[%s2233_s24 + $0x38] sm:$0xff] %vm544_vm1, %v1752_v51  ;;  %v1011_v26 = vpop.f32.mrb[7].mxu1  ;;  %v1265_v56 = vsel %vm544_vm1, %v1247_v45, 0.0  ;;  %v1241_v18 = vsub.f32 %v1752_v51, %v2412_v59 }
 0x3de   : > { %1026 = vst.msk [vmem:[%s2233_s24 + $0x30] sm:$0xff] %vm544_vm1, %v1011_v26  ;;  %1260 = vadd.xlane.f32.xlu0 %v1259_v29  ;;  %v1240_v12 = vsub.f32 %v1011_v26, %v2405_v57  ;;  %v1262_v36 = vsel %vm544_vm1, %v1246_v34, 0.0  ;;  %s1599_s24 = sshll.u32 %s2069_s28, 4 }
 0x3df   : > { %v1249_v52 = vmul.f32 %v1241_v18, %v1241_v18  ;;  %s2614_s25 = scalar_lea.hbm %s2734_s5, %s1599_s24 }
 0x3e0   : > { %v1248_v19 = vmul.f32 %v1240_v12, %v1240_v12 }
 0x3e1   : > { %v1271_v41 = vsel %vm544_vm1, %v1249_v52, 0.0 }
 0x3e2   : > { %1257 = vadd.xlane.f32.xlu0 %v1256_v31  ;;  %v1268_v4 = vsel %vm544_vm1, %v1248_v19, 0.0 }
 0x3e6   : > { %1266 = vadd.xlane.f32.xlu0 %v1265_v56 }
 0x3ea   : > { %1263 = vadd.xlane.f32.xlu0 %v1262_v36 }
 0x3ee   : > { %1269 = vadd.xlane.f32.xlu0 %v1268_v4 }
 0x3f2   : > { %1272 = vadd.xlane.f32.xlu0 %v1271_v41 }
 0x3f3   : > { %1968 = shalt.err (!%p1965_p10)
}
 0x3f4   : > { %s1969_s10 = scalar_lea.hbm %s2614_s25, 16  ;;  %s1973_s9 = scalar_lea.hbm %s2734_s5, 32 }
 0x3f5   : > { %p1970_p11 = scmp.ne.s32.totalorder %s2614_s25, %s1969_s10  ;;  %p1974_p0 = scmp.lt.u32.totalorder %s2614_s25, %s2734_s5 }
 0x3f6   : > { %p1975_p1 = scmp.lt.u32.totalorder %s1973_s9, %s1969_s10  ;;  %p1977_p4 = scmp.lt.u32.totalorder %s1969_s10, %s2614_s25 }
 0x3f7   : > { %p1971_p12 = pnand %p1970_p11, %p2180_p3 }
 0x3f8   : > { %p1976_p2 = por %p1975_p1, %p1974_p0 }
 0x3f9   : > { %p1972_p13 = pneg %p1971_p12 }
 0x3fa   : > { %p1978_p5 = por %p1977_p4, %p1976_p2 }
 0x3fc   : > { %p1979_p6 = pnand %p1978_p5, %p1972_p13 }
 0x3fe   : > { %1982 = shalt.err (!%p1979_p6)
}
 0x3ff   : > { %1871 = dma.vmem_to_hbm [thread:$0]  (%p2180_p3), %s1354_s26, 16, %s2614_s25, %s1325_s29   ;;  %v1223_v57 = vld [vmem:[%s2238_s23 + $0x8] sm:$0xff]  ;;  %v1222_v59 = vld [vmem:[%s2238_s23] sm:$0xff]  ;;  %v1225_v49 = vld [vmem:[%s2238_s23 + $0x18] sm:$0xff] }
 0x400   : > { %s1604_s30 = sshll.u32 %s2069_s28, 9  ;;  %s1366_s24 = sshll.u32 %s2238_s23, 4  ;;  %v1224_v50 = vld [vmem:[%s2238_s23 + $0x10] sm:$0xff]  ;;  %s2647_s24 = int_to_ptr.vmem [resolvable:$true] %s1366_s24 }
 0x401   : > { %s2645_s19 = scalar_lea.hbm %s2735_s6, %s1604_s30  ;;  %s1329_s25 = scalar_lea.sflag [#allocation5], %s2201_s18 }
 0x402   : > { %s1983_s28 = scalar_lea.vmem %s2647_s24, 512  ;;  %s2088_s29 = smov [#allocation4]  }
 0x403   : > { %p1984_p7 = scmp.ne.s32.totalorder %s2647_s24, %s1983_s28  ;;  %s1987_s27 = sshll.u32 %s2088_s29, 4  ;;  %s1988_s27 = int_to_ptr.vmem [resolvable:$false] %s1987_s27 }
 0x404   : > { %s1989_s11 = scalar_lea.vmem %s1988_s27, 1024  ;;  %p1990_p11 = scmp.lt.s32.totalorder %s2647_s24, %s1988_s27 }
 0x405   : > { %p1985_p8 = pnand %p1984_p7, %p2180_p3  ;;  %p1991_p12 = scmp.lt.s32.totalorder %s1989_s11, %s1983_s28 }
 0x407   : > { %p1986_p10 = pneg %p1985_p8  ;;  %p1992_p13 = por %p1991_p12, %p1990_p11 }
 0x409   : > { %p1993_p0 = pnand %p1992_p13, %p1986_p10 }
 0x420   : > { %v1771_v27 = vpop.f32.mrb[8].mxu1 }
 0x421   : > { %v1227_v28 = vadd.f32 %v1771_v27, %v1223_v57  ;;  %v1203_v42 = vpop.f32.mrb[9].mxu1 }
 0x422   : > { %v1226_v46 = vadd.f32 %v1222_v59, %v1203_v42 }
 0x423   : > { %1231 = vst [vmem:[%s2238_s23 + $0x8] sm:$0xff] %v1227_v28 }
 0x424   : > { %1230 = vst [vmem:[%s2238_s23] sm:$0xff] %v1226_v46 }
 0x428   : > { %v1774_v53 = vpop.f32.mrb[10].mxu1 }
 0x429   : > { %v1229_v58 = vadd.f32 %v1774_v53, %v1225_v49  ;;  %v1213_v38 = vpop.f32.mrb[11].mxu1 }
 0x42a   : > { %v1228_v39 = vadd.f32 %v1224_v50, %v1213_v38 }
 0x42b   : > { %1233 = vst [vmem:[%s2238_s23 + $0x18] sm:$0xff] %v1229_v58 }
 0x42c   : > { %1232 = vst [vmem:[%s2238_s23 + $0x10] sm:$0xff] %v1228_v39 }
 0x42d   : > { %1996 = shalt.err (!%p1993_p0)
}
 0x42e   : > { %s1997_s23 = scalar_lea.hbm %s2645_s19, 512  ;;  %s2001_s10 = scalar_lea.hbm %s2735_s6, 1024 }
 0x42f   : > { %p1998_p1 = scmp.ne.s32.totalorder %s2645_s19, %s1997_s23  ;;  %p2002_p5 = scmp.lt.u32.totalorder %s2645_s19, %s2735_s6 }
 0x430   : > { %p2003_p6 = scmp.lt.u32.totalorder %s2001_s10, %s1997_s23  ;;  %p2005_p8 = scmp.lt.u32.totalorder %s1997_s23, %s2645_s19 }
 0x431   : > { %p1999_p2 = pnand %p1998_p1, %p2180_p3 }
 0x432   : > { %p2004_p7 = por %p2003_p6, %p2002_p5 }
 0x433   : > { %p2000_p4 = pneg %p1999_p2 }
 0x434   : > { %p2006_p10 = por %p2005_p8, %p2004_p7 }
 0x436   : > { %p2007_p11 = pnand %p2006_p10, %p2000_p4 }
 0x438   : > { %2010 = shalt.err (!%p2007_p11)
}
 0x439   : > { %s2089_s9 = smov 128   ;;  %s2090_s22 = smov 8   ;;  %v1590_v32 = vsel %vm472_vm13, 1.0, %v2086_v6  ;;  %v1591_v33 = vsel %vm473_vm12, 1.0, %v2086_v6  ;;  %v1592_v0 = vsel %vm474_vm14, 1.0, %v2086_v6  ;;  %v1593_v7 = vsel %vm475_vm15, 1.0, %v2086_v6 }
 0x43a   : > { %1872 = dma.vmem_to_hbm [thread:$0]  (%p2180_p3), %s2647_s24, 512, %s2645_s19, %s1329_s25, %s2089_s9, %s2089_s9, %s2090_s22   ;;  %v1594_v54 = vsel %vm476_vm0, 1.0, %v2086_v6  ;;  %v1595_v60 = vsel %vm477_vm2, 1.0, %v2086_v6  ;;  %v1596_v13 = vsel %vm478_vm3, 1.0, %v2086_v6  ;;  %vm2758_vm1 = vcmp.lt.s32.totalorder %v2503_v40, 384 }
 0x43b   : > { %v1597_v44 = vsel %vm2758_vm1, 1.0, %v2086_v6  ;;  %v1298_v26 = vld [vmem:[%s2218_s16] sm:$0x1]  ;;  %vm1313_vm12 = vcmask 0  }
 0x463   : > { %v1255_v61 = vpop.xlane.xlu0 %1254 }
 0x464   : > { %v1291_v35 = vmul.f32 %v1591_v33, %v1255_v61 }
 0x467   : > { %v1252_v62 = vpop.xlane.xlu0 %1251 }
 0x468   : > { %v1290_v2 = vmul.f32 %v1590_v32, %v1252_v62 }
 0x46a   : > { %v1299_v47 = vadd.f32 %v1291_v35, %v1290_v2 }
 0x46b   : > { %v1261_v10 = vpop.xlane.xlu0 %1260 }
 0x46c   : > { %v1293_v9 = vmul.f32 %v1593_v7, %v1261_v10 }
 0x46f   : > { %v1258_v24 = vpop.xlane.xlu0 %1257 }
 0x470   : > { %v1292_v5 = vmul.f32 %v1592_v0, %v1258_v24 }
 0x472   : > { %v1300_v8 = vadd.f32 %v1299_v47, %v1292_v5 }
 0x473   : > { %v1267_v55 = vpop.xlane.xlu0 %1266 }
 0x474   : > { %v1301_v43 = vadd.f32 %v1300_v8, %v1293_v9  ;;  %v1295_v63 = vmul.f32 %v1595_v60, %v1267_v55 }
 0x477   : > { %v1264_v11 = vpop.xlane.xlu0 %1263 }
 0x478   : > { %v1294_v48 = vmul.f32 %v1594_v54, %v1264_v11 }
 0x47a   : > { %v1302_v14 = vadd.f32 %v1301_v43, %v1294_v48 }
 0x47b   : > { %v1270_v15 = vpop.xlane.xlu0 %1269 }
 0x47c   : > { %v1303_v17 = vadd.f32 %v1302_v14, %v1295_v63  ;;  %v1296_v1 = vmul.f32 %v1596_v13, %v1270_v15 }
 0x47e   : > { %v1304_v20 = vadd.f32 %v1303_v17, %v1296_v1 }
 0x47f   : > { %v1273_v3 = vpop.xlane.xlu0 %1272 }
 0x480   : > { %v1297_v16 = vmul.f32 %v1597_v44, %v1273_v3 }
 0x482   : > { %v1305_v21 = vadd.f32 %v1304_v20, %v1297_v16 }
 0x484   : > { %v1306_v22 = vrot.slane %v1305_v21, 4 }
 0x486   : > { %v1307_v51 = vadd.f32 %v1306_v22, %v1305_v21 }
 0x488   : > { %v1308_v23 = vrot.slane %v1307_v51, 2 }
 0x48a   : > { %v1309_v37 = vadd.f32 %v1308_v23, %v1307_v51 }
 0x48c   : > { %v1310_v25 = vrot.slane %v1309_v37, 1 }
 0x48e   : > { %v1311_v29 = vadd.f32 %v1310_v25, %v1309_v37 }
 0x490   : > { %v1312_v45 = vadd.f32 %v1311_v29, %v1298_v26 }
 0x492   : > { %1314 = vst.msk [vmem:[%s2218_s16] sm:$0x1] %vm1313_vm12, %v1312_v45 }
 0x493 PF: > { %s2759_s13 = sld [smem:[#allocation8_spill]]  ;;  %p1882_p3 = scmp.ge.s32.totalorder %s2081_s8, 2 }
 0x495   : > { %p1876_p12 = pnand %p1882_p3, %p2190_p9 }
 0x499   : > { %s1396_s15 = sand.u32 1, %s2759_s13  }
 0x49a   : > { %s1397_s30 = scalar_lea.sflag [#allocation3], %s1396_s15 }
 0x49b   : > { %2044 = dma.done.wait (!%p1876_p12), %s1397_s30, 16  }
 0x49c   : > { %2046 = vsyncadd (!%p1876_p12), %s1397_s30, 4294967280  ;;  %s1405_s24 = scalar_lea.sflag [#allocation5], %s1396_s15 }
 0x49d   : > { %2048 = dma.done.wait (!%p1876_p12), %s1405_s24, 512  }
 0x49e   : > { %2050 = vsyncadd (!%p1876_p12), %s1405_s24, 4294966784  ;;  %s24_s8 = sadd.s32 1, %s2081_s8   ;;  %s2761_s24 = sld [smem:[#allocation9_spill]] }
 0x49f   : > { %p21_p13 = scmp.ge.s32.totalorder %s24_s8, 8   ;;  %s2762_s25 = sld [smem:[#allocation10_spill]] }
 0x4a0   : > { %s2763_s26 = sld [smem:[#allocation16_spill]]  ;;  %s2764_s27 = sld [smem:[#allocation11_spill]] }
 0x4a1   : > { %s2765_s28 = sld [smem:[#allocation12_spill]]  ;;  %s2766_s29 = sld [smem:[#allocation13_spill]] }
 0x4a2   : > { %s2767_s30 = sld [smem:[#allocation14_spill]]  ;;  %23 = sbr.rel (!%p21_p13) target bundleno = 7 (0x7), region = 119 }
 0x4a9   :  { %1416 = vsyncpa [#allocation3], 1 }
 0x4aa   :  { %1418 = vsyncpa [#allocation3 + $0x1], 1 }
 0x4ab   :  { %1419 = vsyncpa [#allocation5], 1 }
 0x4ac   :  { %1421 = vsyncpa [#allocation5 + $0x1], 1 }

</bundles_post_ra>
